<compile_context>
chip_gen: v7x
topology: tpu7x:2x2x1
jax: 0.10.0
libtpu: 0.0.40
codegen_flags: <defaults>
</compile_context>

<pallas_src>
import numpy as np
import jax
import jax.numpy as jnp
from jax.experimental import pallas as pl
from jax.experimental.pallas import tpu as pltpu


def _upsample_kernel(src_ref, x_ref, scat_ref, o_ref):
    # src_ref : SMEM (Cout * n_k,) int32 -- source input channel per (c, tap)
    # x_ref   : VMEM (Cin, H, W)         -- one batch element (N squeezed)
    # scat_ref: VMEM (n_k, W, r^2*W)     -- one-hot scatter matrices
    # o_ref   : VMEM (Cb, H, r^2*W)      -- Cb output channels of the
    #                                       (N, Cout, H, r^2*W) output view
    n_k = scat_ref.shape[0]
    cb = o_ref.shape[0]
    c0 = pl.program_id(1) * cb
    for cc in range(cb):                      # static unroll: channels per block
        c = c0 + cc
        acc = jnp.zeros(o_ref.shape[1:], jnp.float32)
        for k in range(n_k):                  # static unroll: scatter taps
            s = src_ref[c * n_k + k]          # scalar read from SMEM
            acc = acc + jnp.dot(x_ref[s].astype(jnp.float32), scat_ref[k],
                                preferred_element_type=jnp.float32)
        o_ref[cc] = acc.astype(o_ref.dtype)


def channel_dup_pixel_unshuffle_upsample(x, out_channels, factor):
    """pixel_shuffle(repeat_interleave(x, repeats, dim=1), factor) in NCHW."""
    N, in_channels, H, W = x.shape
    r = int(factor)
    r2 = r * r
    assert out_channels * r2 % in_channels == 0
    repeats = out_channels * r2 // in_channels

    # Source input channel for every (output channel c, tap k = i*r + j).
    src = np.array([[(c * r2 + k) // repeats for k in range(r2)]
                    for c in range(out_channels)], dtype=np.int32)      # (Cout, r2)

    # One-hot scatter matrices mapping input lane w to output lane i*r*W + w*r + j
    # of the (..., H, r^2*W) output view.
    scat = np.zeros((r2, W, r2 * W), dtype=np.float32)
    for k in range(r2):
        i, j = divmod(k, r)
        scat[k, np.arange(W), i * r * W + np.arange(W) * r + j] = 1.0

    # Common case (e.g. repeats == factor^2): each output channel reads exactly
    # one input channel -> fold all taps into a single matmul per channel.
    if bool(np.all(src == src[:, :1])):
        scat = scat.sum(axis=0, keepdims=True)                          # (1, W, r2*W)
        src_tab = jnp.asarray(src[:, 0])                                # (Cout,)
    else:
        src_tab = jnp.asarray(src.reshape(-1))                          # (Cout*r2,)
    n_k = scat.shape[0]
    scat = jnp.asarray(scat)

    # Several output channels per grid step (amortize per-step overhead), capped
    # so double-buffered blocks stay comfortably inside VMEM on all generations.
    itemsize = jnp.dtype(x.dtype).itemsize
    plane_bytes = H * r2 * W * itemsize
    cb = max(1, min(out_channels, (2 * 1024 * 1024) // max(plane_bytes, 1)))
    while out_channels % cb:
        cb -= 1

    out_view = pl.pallas_call(
        _upsample_kernel,
        out_shape=jax.ShapeDtypeStruct((N, out_channels, H, r2 * W), x.dtype),
        grid_spec=pltpu.PrefetchScalarGridSpec(
            num_scalar_prefetch=1,
            grid=(N, out_channels // cb),
            in_specs=[
                # Whole image of one batch element; block index is constant
                # across the channel grid axis so it is DMA'd once per n.
                pl.BlockSpec((None, in_channels, H, W),
                             lambda n, c, tab: (n, 0, 0, 0)),
                pl.BlockSpec((n_k, W, r2 * W), lambda n, c, tab: (0, 0, 0)),
            ],
            out_specs=pl.BlockSpec((None, cb, H, r2 * W),
                                   lambda n, c, tab: (n, c, 0, 0)),
        ),
        compiler_params=pltpu.CompilerParams(
            dimension_semantics=("parallel", "parallel")),
    )(src_tab, x, scat)

    # (N, Cout, H, r^2*W) -> (N, Cout, H*r, W*r): identical flat layout => free.
    return out_view.reshape(N, out_channels, H * r, W * r)


def reference(x, out_channels, factor):
    """Pure-JAX reference mirroring the PyTorch forward (NCHW)."""
    N, in_channels, H, W = x.shape
    r = factor
    repeats = out_channels * r * r // in_channels
    y = jnp.repeat(x, repeats, axis=1)                  # repeat_interleave(dim=1)
    y = y.reshape(N, out_channels, r, r, H, W)          # pixel_shuffle
    y = jnp.transpose(y, (0, 1, 4, 2, 5, 3))
    return y.reshape(N, out_channels, H * r, W * r)


if __name__ == "__main__":
    key = jax.random.PRNGKey(0)
    k0, k1 = jax.random.split(key)

    # Primary config: in_channels == out_channels, factor 2 (repeats = 4).
    N, Cin, H, W = 2, 4, 16, 16
    out_channels, factor = 4, 2
    x = jax.random.normal(k0, (N, Cin, H, W), jnp.float32)

    out = channel_dup_pixel_unshuffle_upsample(x, out_channels, factor)
    out = jax.block_until_ready(out)
    assert out.shape == (N, out_channels, H * factor, W * factor)
    ref = reference(x, out_channels, factor)
    err = float(jnp.max(jnp.abs(out - ref)))
    assert err < 1e-6, f"mismatch vs reference: max_err={err}"

    # Secondary config exercising the general multi-source path (repeats = 2).
    x2 = jax.random.normal(k1, (2, 4, 8, 8), jnp.float32)
    out2 = jax.block_until_ready(channel_dup_pixel_unshuffle_upsample(x2, 2, 2))
    ref2 = reference(x2, 2, 2)
    err2 = float(jnp.max(jnp.abs(out2 - ref2)))
    assert err2 < 1e-6, f"mismatch vs reference (multi-source): max_err={err2}"

    print("KERNEL_OK")
</pallas_src>

<mosaic_0001>
module attributes {stable_mosaic.version = 11 : i64} {
  func.func @_upsample_kernel(%arg0: i32, %arg1: i32, %arg2: memref<4xi32, #tpu.memory_space<smem>>, %arg3: memref<1x4x16x16xf32, #tpu.memory_space<vmem>>, %arg4: memref<1x16x64xf32, #tpu.memory_space<vmem>>, %arg5: memref<1x4x16x64xf32, #tpu.memory_space<vmem>>) attributes {dimension_semantics = [#tpu.dimension_semantics<parallel>, #tpu.dimension_semantics<parallel>], iteration_bounds = array<i64: 2, 1>, scalar_prefetch = 1 : i64, scratch_operands = 0 : i64, tpu.core_type = #tpu.core_type<tc>, window_params = [{transform_indices = @transform_0, window_bounds = array<i64: 1, 4, 16, 16>}, {pipeline_mode = #tpu.pipeline_mode<synchronous>, transform_indices = @transform_1, window_bounds = array<i64: 1, 16, 64>}, {transform_indices = @transform_2, window_bounds = array<i64: 1, 4, 16, 64>}]} {
    %c4_i32 = arith.constant 4 : i32
    %0 = arith.muli %arg1, %c4_i32 : i32
    %c0_i32 = arith.constant 0 : i32
    %1 = arith.addi %0, %c0_i32 : i32
    %cst = arith.constant 0.000000e+00 : f32
    %2 = vector.broadcast %cst : f32 to vector<16x64xf32>
    %c1_i32 = arith.constant 1 : i32
    %3 = arith.muli %1, %c1_i32 : i32
    %c0_i32_0 = arith.constant 0 : i32
    %4 = arith.addi %3, %c0_i32_0 : i32
    %5 = arith.index_cast %4 : i32 to index
    %6 = memref.load %arg2[%5] : memref<4xi32, #tpu.memory_space<smem>>
    %c0 = arith.constant 0 : index
    %7 = arith.index_cast %6 : i32 to index
    %c0_1 = arith.constant 0 : index
    %c0_2 = arith.constant 0 : index
    %8 = vector.load %arg3[%c0, %7, %c0_1, %c0_2] : memref<1x4x16x16xf32, #tpu.memory_space<vmem>>, vector<1x1x16x16xf32>
    %9 = vector.shape_cast %8 : vector<1x1x16x16xf32> to vector<16x16xf32>
    %c0_3 = arith.constant 0 : index
    %c0_4 = arith.constant 0 : index
    %c0_5 = arith.constant 0 : index
    %10 = vector.load %arg4[%c0_3, %c0_4, %c0_5] : memref<1x16x64xf32, #tpu.memory_space<vmem>>, vector<1x16x64xf32>
    %11 = vector.shape_cast %10 : vector<1x16x64xf32> to vector<16x64xf32>
    %cst_6 = arith.constant dense<0.000000e+00> : vector<16x64xf32>
    %12 = tpu.matmul %9, %11, %cst_6 {dimension_numbers = #tpu.dot_dimension_numbers<[1], [0], [0], [1], [0, 0, 1, 1], [], []>} : vector<16x16xf32>, vector<16x64xf32>, vector<16x64xf32> -> vector<16x64xf32>
    %13 = arith.addf %2, %12 : vector<16x64xf32>
    %c0_7 = arith.constant 0 : index
    %c0_8 = arith.constant 0 : index
    %c0_9 = arith.constant 0 : index
    %c0_10 = arith.constant 0 : index
    %14 = vector.load %arg5[%c0_7, %c0_8, %c0_9, %c0_10] : memref<1x4x16x64xf32, #tpu.memory_space<vmem>>, vector<1x1x16x64xf32>
    %15 = vector.shape_cast %14 : vector<1x1x16x64xf32> to vector<16x64xf32>
    %16 = vector.shape_cast %13 : vector<16x64xf32> to vector<1x1x16x64xf32>
    tpu.vector_store %arg5[%c0_7, %c0_8, %c0_9, %c0_10], %16 {strides = array<i32>} : memref<1x4x16x64xf32, #tpu.memory_space<vmem>>, vector<1x1x16x64xf32>,
    %c1_i32_11 = arith.constant 1 : i32
    %17 = arith.addi %0, %c1_i32_11 : i32
    %cst_12 = arith.constant 0.000000e+00 : f32
    %18 = vector.broadcast %cst_12 : f32 to vector<16x64xf32>
    %c1_i32_13 = arith.constant 1 : i32
    %19 = arith.muli %17, %c1_i32_13 : i32
    %c0_i32_14 = arith.constant 0 : i32
    %20 = arith.addi %19, %c0_i32_14 : i32
    %21 = arith.index_cast %20 : i32 to index
    %22 = memref.load %arg2[%21] : memref<4xi32, #tpu.memory_space<smem>>
    %c0_15 = arith.constant 0 : index
    %23 = arith.index_cast %22 : i32 to index
    %c0_16 = arith.constant 0 : index
    %c0_17 = arith.constant 0 : index
    %24 = vector.load %arg3[%c0_15, %23, %c0_16, %c0_17] : memref<1x4x16x16xf32, #tpu.memory_space<vmem>>, vector<1x1x16x16xf32>
    %25 = vector.shape_cast %24 : vector<1x1x16x16xf32> to vector<16x16xf32>
    %c0_18 = arith.constant 0 : index
    %c0_19 = arith.constant 0 : index
    %c0_20 = arith.constant 0 : index
    %26 = vector.load %arg4[%c0_18, %c0_19, %c0_20] : memref<1x16x64xf32, #tpu.memory_space<vmem>>, vector<1x16x64xf32>
    %27 = vector.shape_cast %26 : vector<1x16x64xf32> to vector<16x64xf32>
    %cst_21 = arith.constant dense<0.000000e+00> : vector<16x64xf32>
    %28 = tpu.matmul %25, %27, %cst_21 {dimension_numbers = #tpu.dot_dimension_numbers<[1], [0], [0], [1], [0, 0, 1, 1], [], []>} : vector<16x16xf32>, vector<16x64xf32>, vector<16x64xf32> -> vector<16x64xf32>
    %29 = arith.addf %18, %28 : vector<16x64xf32>
    %c0_22 = arith.constant 0 : index
    %c1 = arith.constant 1 : index
    %c0_23 = arith.constant 0 : index
    %c0_24 = arith.constant 0 : index
    %30 = vector.load %arg5[%c0_22, %c1, %c0_23, %c0_24] : memref<1x4x16x64xf32, #tpu.memory_space<vmem>>, vector<1x1x16x64xf32>
    %31 = vector.shape_cast %30 : vector<1x1x16x64xf32> to vector<16x64xf32>
    %32 = vector.shape_cast %29 : vector<16x64xf32> to vector<1x1x16x64xf32>
    tpu.vector_store %arg5[%c0_22, %c1, %c0_23, %c0_24], %32 {strides = array<i32>} : memref<1x4x16x64xf32, #tpu.memory_space<vmem>>, vector<1x1x16x64xf32>,
    %c2_i32 = arith.constant 2 : i32
    %33 = arith.addi %0, %c2_i32 : i32
    %cst_25 = arith.constant 0.000000e+00 : f32
    %34 = vector.broadcast %cst_25 : f32 to vector<16x64xf32>
    %c1_i32_26 = arith.constant 1 : i32
    %35 = arith.muli %33, %c1_i32_26 : i32
    %c0_i32_27 = arith.constant 0 : i32
    %36 = arith.addi %35, %c0_i32_27 : i32
    %37 = arith.index_cast %36 : i32 to index
    %38 = memref.load %arg2[%37] : memref<4xi32, #tpu.memory_space<smem>>
    %c0_28 = arith.constant 0 : index
    %39 = arith.index_cast %38 : i32 to index
    %c0_29 = arith.constant 0 : index
    %c0_30 = arith.constant 0 : index
    %40 = vector.load %arg3[%c0_28, %39, %c0_29, %c0_30] : memref<1x4x16x16xf32, #tpu.memory_space<vmem>>, vector<1x1x16x16xf32>
    %41 = vector.shape_cast %40 : vector<1x1x16x16xf32> to vector<16x16xf32>
    %c0_31 = arith.constant 0 : index
    %c0_32 = arith.constant 0 : index
    %c0_33 = arith.constant 0 : index
    %42 = vector.load %arg4[%c0_31, %c0_32, %c0_33] : memref<1x16x64xf32, #tpu.memory_space<vmem>>, vector<1x16x64xf32>
    %43 = vector.shape_cast %42 : vector<1x16x64xf32> to vector<16x64xf32>
    %cst_34 = arith.constant dense<0.000000e+00> : vector<16x64xf32>
    %44 = tpu.matmul %41, %43, %cst_34 {dimension_numbers = #tpu.dot_dimension_numbers<[1], [0], [0], [1], [0, 0, 1, 1], [], []>} : vector<16x16xf32>, vector<16x64xf32>, vector<16x64xf32> -> vector<16x64xf32>
    %45 = arith.addf %34, %44 : vector<16x64xf32>
    %c0_35 = arith.constant 0 : index
    %c2 = arith.constant 2 : index
    %c0_36 = arith.constant 0 : index
    %c0_37 = arith.constant 0 : index
    %46 = vector.load %arg5[%c0_35, %c2, %c0_36, %c0_37] : memref<1x4x16x64xf32, #tpu.memory_space<vmem>>, vector<1x1x16x64xf32>
    %47 = vector.shape_cast %46 : vector<1x1x16x64xf32> to vector<16x64xf32>
    %48 = vector.shape_cast %45 : vector<16x64xf32> to vector<1x1x16x64xf32>
    tpu.vector_store %arg5[%c0_35, %c2, %c0_36, %c0_37], %48 {strides = array<i32>} : memref<1x4x16x64xf32, #tpu.memory_space<vmem>>, vector<1x1x16x64xf32>,
    %c3_i32 = arith.constant 3 : i32
    %49 = arith.addi %0, %c3_i32 : i32
    %cst_38 = arith.constant 0.000000e+00 : f32
    %50 = vector.broadcast %cst_38 : f32 to vector<16x64xf32>
    %c1_i32_39 = arith.constant 1 : i32
    %51 = arith.muli %49, %c1_i32_39 : i32
    %c0_i32_40 = arith.constant 0 : i32
    %52 = arith.addi %51, %c0_i32_40 : i32
    %53 = arith.index_cast %52 : i32 to index
    %54 = memref.load %arg2[%53] : memref<4xi32, #tpu.memory_space<smem>>
    %c0_41 = arith.constant 0 : index
    %55 = arith.index_cast %54 : i32 to index
    %c0_42 = arith.constant 0 : index
    %c0_43 = arith.constant 0 : index
    %56 = vector.load %arg3[%c0_41, %55, %c0_42, %c0_43] : memref<1x4x16x16xf32, #tpu.memory_space<vmem>>, vector<1x1x16x16xf32>
    %57 = vector.shape_cast %56 : vector<1x1x16x16xf32> to vector<16x16xf32>
    %c0_44 = arith.constant 0 : index
    %c0_45 = arith.constant 0 : index
    %c0_46 = arith.constant 0 : index
    %58 = vector.load %arg4[%c0_44, %c0_45, %c0_46] : memref<1x16x64xf32, #tpu.memory_space<vmem>>, vector<1x16x64xf32>
    %59 = vector.shape_cast %58 : vector<1x16x64xf32> to vector<16x64xf32>
    %cst_47 = arith.constant dense<0.000000e+00> : vector<16x64xf32>
    %60 = tpu.matmul %57, %59, %cst_47 {dimension_numbers = #tpu.dot_dimension_numbers<[1], [0], [0], [1], [0, 0, 1, 1], [], []>} : vector<16x16xf32>, vector<16x64xf32>, vector<16x64xf32> -> vector<16x64xf32>
    %61 = arith.addf %50, %60 : vector<16x64xf32>
    %c0_48 = arith.constant 0 : index
    %c3 = arith.constant 3 : index
    %c0_49 = arith.constant 0 : index
    %c0_50 = arith.constant 0 : index
    %62 = vector.load %arg5[%c0_48, %c3, %c0_49, %c0_50] : memref<1x4x16x64xf32, #tpu.memory_space<vmem>>, vector<1x1x16x64xf32>
    %63 = vector.shape_cast %62 : vector<1x1x16x64xf32> to vector<16x64xf32>
    %64 = vector.shape_cast %61 : vector<16x64xf32> to vector<1x1x16x64xf32>
    tpu.vector_store %arg5[%c0_48, %c3, %c0_49, %c0_50], %64 {strides = array<i32>} : memref<1x4x16x64xf32, #tpu.memory_space<vmem>>, vector<1x1x16x64xf32>,
    return
  }
  func.func @transform_0(%arg0: i32, %arg1: i32, %arg2: memref<4xi32, #tpu.memory_space<smem>>) -> (i32, i32, i32, i32) {
    %c0_i32 = arith.constant 0 : i32
    %c0_i32_0 = arith.constant 0 : i32
    %c0_i32_1 = arith.constant 0 : i32
    %c0_i32_2 = arith.constant 0 : i32
    return %arg0, %c0_i32, %c0_i32_0, %c0_i32_1 : i32, i32, i32, i32
  }
  func.func @transform_1(%arg0: i32, %arg1: i32, %arg2: memref<4xi32, #tpu.memory_space<smem>>) -> (i32, i32, i32) {
    %c0_i32 = arith.constant 0 : i32
    %c0_i32_0 = arith.constant 0 : i32
    %c0_i32_1 = arith.constant 0 : i32
    %c0_i32_2 = arith.constant 0 : i32
    return %c0_i32, %c0_i32_0, %c0_i32_1 : i32, i32, i32
  }
  func.func @transform_2(%arg0: i32, %arg1: i32, %arg2: memref<4xi32, #tpu.memory_space<smem>>) -> (i32, i32, i32, i32) {
    %c0_i32 = arith.constant 0 : i32
    %c0_i32_0 = arith.constant 0 : i32
    %c0_i32_1 = arith.constant 0 : i32
    return %arg0, %arg1, %c0_i32, %c0_i32_0 : i32, i32, i32, i32
  }
}

</mosaic_0001>

<bundles_post_ra>
// kernel: tpu_custom_call.1
= control target key start
LH: loop header
LB: loop body
LE: loop exit
PB: predicated region body
PF: predicated region fallthrough
CT: control target
= control target key end

     0   :  { %s1306_s0 = inlined_call_operand.hbm [shape: s32[4], index: 0, kind: input, shape index: {}]   ;;  %s1307_s1 = inlined_call_operand.hbm [shape: f32[2,4,16,16], index: 1, kind: input, shape index: {}]   ;;  %s1308_s2 = inlined_call_operand.hbm [shape: f32[1,16,64], index: 2, kind: input, shape index: {}]   ;;  %s1309_s3 = inlined_call_operand.hbm [shape: f32[2,4,16,64], index: 3, kind: output, shape index: {}]  }
   0x1   :  { %s863_s14 = scalar_lea.hbm %s1306_s0, 16 }
   0x2   :  { %p864_p0 = scmp.ne.s32.totalorder %s1306_s0, %s863_s14  ;;  %p867_p1 = scmp.lt.u32.totalorder %s863_s14, %s1306_s0 }
   0x4   :  { %p869_p2 = pnand %p867_p1, %p864_p0 }
   0x6   :  { %872 = shalt.err (!%p869_p2)  }
   0x7   :  { %s1021_s19 = smov [#allocation3]  }
   0x8   :  { %9 = dma.hbm_to_smem %s1306_s0, 16, %s1021_s19, [#allocation2] }
   0x9   :  { %983 = dma.done.wait [#allocation2], 16 }
   0xa   :  { %984 = vsyncadd [#allocation2], 4294967280 }
   0xb   :  { %11 = sfence }
   0xc   :  { %12 = vsyncpa [#allocation5], 0 }
   0xd   :  { %14 = vsyncpa [#allocation5 + $0x1], 0 }
   0xe   :  { %15 = vsyncpa [#allocation8], 0 }
   0xf   :  { %16 = vsyncpa [#allocation6], 0 }
  0x10   :  { %18 = vsyncpa [#allocation6 + $0x1], 0  ;;  %s1061_s22 = smov 0   ;;  %s1063_s23 = smov 0  }
  0x11   :  { %s1065_s24 = smov 0   ;;  %s1067_s25 = smov 0  }
  0x12   :  { %s1069_s26 = smov 0   ;;  %s1071_s27 = smov 0  }
  0x13 LB: > { %s685_s0 = sadd.s32 4294967295, %s1019_s27   ;;  %s686_s28 = sadd.s32 4294967294, %s1019_s27   ;;  %s1019_s27 = sphi %s1071_s27, %s24_s27   ;;  %s1015_s26 = sphi %s1069_s26, %s1333_s26   ;;  %s1011_s25 = sphi %s1067_s25, %s1332_s25   ;;  %s1007_s24 = sphi %s1065_s24, %s1331_s24   ;;  %s1003_s23 = sphi %s1063_s23, %s1330_s23   ;;  %s999_s22 = sphi %s1061_s22, %s1329_s22  }
  0x14   : > { %p56_p3 = scmp.ne.s32.totalorder %s1003_s23, %s999_s22  ;;  %p1095_p4 = scmp.eq.s32.totalorder %s685_s0, 0 }
  0x15   : > { %p1099_p5 = scmp.eq.s32.totalorder %s685_s0, 1  ;;  %p109_p6 = scmp.eq.s32.totalorder %s686_s28, 1 }
  0x16   : > { %s1314_s29 = scalar_select %p1095_p4, 1, 0 }
  0x17   : > { %s1315_s30 = scalar_select %p1099_p5, 1, 0 }
  0x18   : > { %p1105_p7 = por %p1095_p4, %p56_p3  ;;  %p687_p8 = scmp.ge.s32.totalorder %s1019_s27, 1 }
  0x19   : > { %p1110_p9 = por %p109_p6, %p56_p3  ;;  %p116_p10 = scmp.lt.s32.totalorder %s1019_s27, 3 }
  0x1a   : > { %s1316_s4 = scalar_select %p1105_p7, 1, 0 }
  0x1b   : > { %s1317_s5 = scalar_select %p1110_p9, 1, 0 }
  0x1c   : > { %p1115_p11 = pnand %p687_p8, %p116_p10  ;;  %s1022_s7 = smov [#allocation7]  }
  0x1d   : > { %s128_s8 = sshll.u32 %s1022_s7, 4  ;;  %s36_s10 = sadd.s32 1, %s1015_s26  ;;  %s129_s8 = int_to_ptr.vmem [resolvable:$true] %s128_s8 }
  0x1e   : > { %s1318_s6 = scalar_select %p1115_p11, 1, 0 }
  0x1f   : > { %p793_p12 = pneg %p1115_p11  ;;  %s873_s13 = scalar_lea.hbm %s1308_s2, 256 }
  0x20   : > { %p874_p1 = scmp.ne.s32.totalorder %s1308_s2, %s873_s13  ;;  %p880_p8 = scmp.lt.u32.totalorder %s873_s13, %s1308_s2 }
  0x21   : > { %p1124_p0 = pnand %p793_p12, %p1095_p4 }
  0x23   : > { %p875_p2 = pneg %p1124_p0 }
  0x25   : > { %p876_p3 = pnand %p875_p2, %p874_p1 }
  0x27   : > { %p877_p6 = pneg %p876_p3 }
  0x29   : > { %p882_p10 = pnand %p880_p8, %p877_p6 }
  0x2b   : > { %885 = shalt.err (!%p882_p10)
}
  0x2c   : > { %s886_s18 = scalar_lea.vmem %s129_s8, 256  ;;  %p894_p4 = scmp.lt.s32.totalorder %s129_s8, %s129_s8 }
  0x2d   : > { %p887_p12 = scmp.ne.s32.totalorder %s129_s8, %s886_s18  ;;  %p895_p7 = scmp.lt.s32.totalorder %s886_s18, %s886_s18 }
  0x2f   : > { %p889_p13 = pnand %p887_p12, %p875_p2  ;;  %p896_p11 = por %p895_p7, %p894_p4 }
  0x31   : > { %p890_p9 = pneg %p889_p13 }
  0x33   : > { %p897_p5 = pnand %p896_p11, %p890_p9 }
  0x35   : > { %900 = shalt.err (!%p897_p5)
}
  0x36   : > { %s1023_s19 = smov 128   ;;  %s1024_s20 = smov 8  }
  0x37   : > { %796 = dma.hbm_to_vmem [thread:$0]  (!%p1124_p0), %s1308_s2, 256, %s129_s8, [#allocation8], %s1023_s19, %s1023_s19, %s1024_s20  }
  0x38   : > { %p38_p4 = scmp.ge.s32.totalorder %s36_s10, 2  ;;  %s43_s28 = sadd.s32 1, %s1007_s24 }
  0x39   : > { %p50_p5 = scmp.ne.s32.totalorder %s1007_s24, %s1003_s23  ;;  %p51_p7 = scmp.eq.s32.totalorder %s1019_s27, 0 }
  0x3a   : > { %s1335_s10 = smov (%p38_p4, %s36_s10), 0  ;;  %p1321_p11 = scmp.ne.s32.totalorder %s1315_s30, 0 }
  0x3b   : > { %p1154_p9 = por %p51_p7, %p50_p5  ;;  %s40_s11 = ssub.s32 %s1015_s26, %s1335_s10 }
  0x3c   : > { %p1160_p13 = por %p1321_p11, %p50_p5  ;;  %p806_p1 = scmp.lt.s32.totalorder %s1019_s27, 2 }
  0x3d   : > { %p41_p0 = scmp.eq.s32.totalorder %s40_s11, 0  ;;  %s142_s8 = sand.u32 1, %s1007_s24  }
  0x3e   : > { %s690_s12 = sshll.u32 %s142_s8, 6  ;;  %s723_s14 = sshll.u32 %s1015_s26, 10 }
  0x3f   : > { %s1169_s13 = scalar_select %p41_p0, %s1007_s24, %s43_s28  }
  0x40   : > { %s1175_s17 = scalar_lea.hbm %s1307_s1, %s723_s14  ;;  %s146_s30 = scalar_lea.vmem [#allocation4], %s690_s12 }
  0x41   : > { %s153_s18 = sshll.u32 %s146_s30, 4  ;;  %p1181_p2 = pnand %p806_p1, %p1154_p9  ;;  %s1177_s18 = int_to_ptr.vmem [resolvable:$true] %s153_s18 }
  0x42   : > { %s1185_s0 = scalar_lea.sflag [#allocation5], %s142_s8  ;;  %s901_s28 = scalar_lea.hbm %s1175_s17, 1024 }
  0x43   : > { %p902_p3 = scmp.ne.s32.totalorder %s1175_s17, %s901_s28  ;;  %p903_p6 = pneg %p1181_p2 }
  0x44   : > { %s906_s7 = scalar_lea.hbm %s1307_s1, 2048  ;;  %p907_p12 = scmp.lt.u32.totalorder %s1175_s17, %s1307_s1 }
  0x45   : > { %p904_p8 = pnand %p903_p6, %p902_p3  ;;  %p908_p4 = scmp.lt.u32.totalorder %s906_s7, %s901_s28 }
  0x46   : > { %p910_p7 = scmp.lt.u32.totalorder %s901_s28, %s1175_s17 }
  0x47   : > { %p905_p10 = pneg %p904_p8  ;;  %p909_p5 = por %p908_p4, %p907_p12 }
  0x49   : > { %p911_p9 = por %p910_p7, %p909_p5 }
  0x4b   : > { %p912_p11 = pnand %p911_p9, %p905_p10 }
  0x4d   : > { %915 = shalt.err (!%p912_p11)
}
  0x4e   : > { %s916_s8 = scalar_lea.vmem %s1177_s18, 1024  ;;  %s1025_s16 = smov [#allocation4]  }
  0x4f   : > { %p917_p1 = scmp.ne.s32.totalorder %s1177_s18, %s916_s8  ;;  %s921_s30 = sshll.u32 %s1025_s16, 4  ;;  %s922_s30 = int_to_ptr.vmem [resolvable:$false] %s921_s30 }
  0x50   : > { %s923_s11 = scalar_lea.vmem %s922_s30, 2048  ;;  %p924_p8 = scmp.lt.s32.totalorder %s1177_s18, %s922_s30 }
  0x51   : > { %p919_p0 = pnand %p917_p1, %p903_p6  ;;  %p925_p12 = scmp.lt.s32.totalorder %s923_s11, %s916_s8 }
  0x53   : > { %p920_p3 = pneg %p919_p0  ;;  %p926_p4 = por %p925_p12, %p924_p8 }
  0x55   : > { %p927_p5 = pnand %p926_p4, %p920_p3 }
  0x57   : > { %930 = shalt.err (!%p927_p5)
}
  0x58   : > { %800 = dma.hbm_to_vmem [thread:$0]  (!%p1181_p2), %s1175_s17, 1024, %s1177_s18, %s1185_s0, %s1023_s19, %s1023_s19, %s1024_s20  }
  0x59   : > { %p1324_p6 = scmp.ne.s32.totalorder %s1318_s6, 0 }
  0x5a   : > { %s1219_s28 = sand.u32 (!%p1324_p6), 1, %s1003_s23   ;;  %p1325_p10 = scmp.ne.s32.totalorder (!%p1324_p6), %s1316_s4, 0 }
  0x5b   : > { %165 = sbr.rel (%p1324_p6) target bundleno = 345 (0x159), region = 28  ;;  %s694_s12 = sshll.u32 (!%p1324_p6), %s1219_s28, 6 }
  0x5c   : > { %s168_s7 = scalar_lea.sflag (!%p1324_p6), [#allocation5], %s1219_s28  ;;  %s171_s21 = scalar_lea.vmem (!%p1324_p6), [#allocation4], %s694_s12 }
  0x62   : > { %986 = dma.done.wait (%p1325_p10), %s168_s7, 1024  }
  0x63   : > { %988 = vsyncadd (%p1325_p10), %s168_s7, 4294966272  ;;  %p1326_p2 = scmp.ne.s32.totalorder %s1314_s29, 0 }
  0x65   : > { %990 = dma.done.wait (%p1326_p2), [#allocation8], 256  }
  0x66   : > { %992 = vsyncadd (%p1326_p2), [#allocation8], 4294967040  ;;  %s198_s6 = sld [smem:[#allocation3]]  ;;  %s700_s19 = sld [smem:[#allocation3 + $0x1]]  ;;  %v203_v0 = vld [vmem:[#allocation7] sm:$0xff]  ;;  %v204_v1 = vld [vmem:[#allocation7 + $0x8] sm:$0xff] }
  0x67   : > { %s706_s20 = sld [smem:[#allocation3 + $0x2]]  ;;  %s712_s17 = sld [smem:[#allocation3 + $0x3]]  ;;  %v769_v2 = vpack.c.bf16 %v204_v1, %v203_v0  ;;  %vm205_vm0 = vcmask 130048   ;;  %vm287_vm1 = vcmask 523264  }
  0x68   : > { %s195_s30 = scalar_lea.vmem [#allocation9], %s694_s12  ;;  %s724_s7 = sshll.u32 %s1011_s25, 10 }
  0x69   : > { %770 = vmatprep.subr.bf16.mxu0 %v769_v2  ;;  %774 = vmatprep.subr.bf16.mxu1 %v769_v2  ;;  %s583_s11 = sshll.u32 %s195_s30, 4  ;;  %s1253_s25 = scalar_lea.hbm %s1309_s3, %s724_s7  ;;  %s1246_s11 = int_to_ptr.vmem [resolvable:$true] %s583_s11 }
  0x6a   : > { %772 = vmatpush3.bf16.msra.mxu0 %v769_v2  ;;  %776 = vmatpush3.bf16.msra.mxu1 %v769_v2 }
  0x6b   : > { %778 = vmatprep.subr.bf16.mxu0 %v769_v2  ;;  %782 = vmatprep.subr.bf16.mxu1 %v769_v2 }
  0x6c   : > { %s697_s18 = sshll.u32 %s198_s6, 4  ;;  %s701_s0 = sshll.u32 %s700_s19, 4 }
  0x6d   : > { %s200_s14 = scalar_lea.vmem %s171_s21, %s697_s18 [#allocation4]  ;;  %s293_s15 = scalar_lea.vmem %s171_s21, %s701_s0 [#allocation4] }
  0x6e   : > { %v201_v3 = vld [vmem:[%s200_s14] sm:$0xff]  ;;  %s707_s4 = sshll.u32 %s706_s20, 4  ;;  %s713_s8 = sshll.u32 %s712_s17, 4  ;;  %v202_v5 = vld [vmem:[%s200_s14 + $0x8] sm:$0xff] }
  0x6f   : > { %v294_v4 = vld [vmem:[%s293_s15] sm:$0xff]  ;;  %s385_s29 = scalar_lea.vmem %s171_s21, %s707_s4 [#allocation4]  ;;  %s477_s16 = scalar_lea.vmem %s171_s21, %s713_s8 [#allocation4]  ;;  %v295_v6 = vld [vmem:[%s293_s15 + $0x8] sm:$0xff]  ;;  %745 = vmatprep.mubr.msk.f32.mxu0 %vm205_vm0, %v201_v3 }
  0x70   : > { %752 = vmatprep.mubr.msk.f32.mxu1 %vm205_vm0, %v294_v4  ;;  %v386_v7 = vld [vmem:[%s385_s29] sm:$0xff]  ;;  %746 = vmatmul.mubr.msk.f32.vlgmr.msra.gmra.mrb[0].mxu0 %vm205_vm0, %v202_v5  ;;  %v387_v9 = vld [vmem:[%s385_s29 + $0x8] sm:$0xff]  ;;  %s567_s6 = scalar_lea.sflag [#allocation6], %s1219_s28  ;;  %s931_s19 = scalar_lea.vmem %s1246_s11, 1024 }
  0x71   : > { %v478_v8 = vld [vmem:[%s477_s16] sm:$0xff]  ;;  %753 = vmatmul.mubr.msk.f32.vlgmr.msra.gmra.mrb[0].mxu1 %vm205_vm0, %v295_v6  ;;  %780 = vmatpush3.bf16.msra.mxu0 %v769_v2  ;;  %v479_v10 = vld [vmem:[%s477_s16 + $0x8] sm:$0xff]  ;;  %p932_p7 = scmp.ne.s32.totalorder %s1246_s11, %s931_s19  ;;  %s1026_s20 = smov [#allocation9]  }
  0x72   : > { %784 = vmatpush3.bf16.msra.mxu1 %v769_v2  ;;  %759 = vmatprep.mubr.msk.f32.mxu0 %vm205_vm0, %v386_v7  ;;  %s935_s17 = sshll.u32 %s1026_s20, 4  ;;  %s936_s17 = int_to_ptr.vmem [resolvable:$false] %s935_s17 }
  0x73   : > { %766 = vmatprep.mubr.msk.f32.mxu1 %vm205_vm0, %v478_v8  ;;  %p933_p9 = pnand %p932_p7, %p1160_p13  ;;  %s937_s18 = scalar_lea.vmem %s936_s17, 2048 }
  0x74   : > { %760 = vmatmul.mubr.msk.f32.vlgmr.msra.gmra.mrb[2].mxu0 %vm205_vm0, %v387_v9  ;;  %p938_p1 = scmp.lt.s32.totalorder %s1246_s11, %s936_s17  ;;  %p939_p0 = scmp.lt.s32.totalorder %s937_s18, %s931_s19 }
  0x75   : > { %767 = vmatmul.mubr.msk.f32.vlgmr.msra.gmra.mrb[2].mxu1 %vm205_vm0, %v479_v10  ;;  %p934_p11 = pneg %p933_p9 }
  0x76   : > { %p940_p3 = por %p939_p0, %p938_p1 }
  0x78   : > { %p941_p8 = pnand %p940_p3, %p934_p11 }
 0x143   : > { %v747_v11 = vpop.f32.mrb[0].mxu0 }
 0x144   : > { %v754_v12 = vpop.f32.mrb[0].mxu1  ;;  %289 = vst.msk [vmem:[%s195_s30 + $0x8] sm:$0xff] %vm287_vm1, %v747_v11  ;;  %v278_v13 = vpop.f32.mrb[1].mxu0 }
 0x145   : > { %705 = vst.msk [vmem:[%s195_s30 + $0x18] sm:$0xff] %vm287_vm1, %v754_v12  ;;  %v370_v14 = vpop.f32.mrb[1].mxu1  ;;  %288 = vst.msk [vmem:[%s195_s30] sm:$0xff] %vm287_vm1, %v278_v13 }
 0x146   : > { %704 = vst.msk [vmem:[%s195_s30 + $0x10] sm:$0xff] %vm287_vm1, %v370_v14 }
 0x147   : > { %v761_v15 = vpop.f32.mrb[2].mxu0 }
 0x148   : > { %v768_v16 = vpop.f32.mrb[2].mxu1  ;;  %711 = vst.msk [vmem:[%s195_s30 + $0x28] sm:$0xff] %vm287_vm1, %v761_v15  ;;  %v462_v17 = vpop.f32.mrb[3].mxu0 }
 0x149   : > { %717 = vst.msk [vmem:[%s195_s30 + $0x38] sm:$0xff] %vm287_vm1, %v768_v16  ;;  %v554_v18 = vpop.f32.mrb[3].mxu1  ;;  %710 = vst.msk [vmem:[%s195_s30 + $0x20] sm:$0xff] %vm287_vm1, %v462_v17 }
 0x14a   : > { %716 = vst.msk [vmem:[%s195_s30 + $0x30] sm:$0xff] %vm287_vm1, %v554_v18 }
 0x14b   : > { %944 = shalt.err (!%p941_p8)
}
 0x14c   : > { %s945_s0 = scalar_lea.hbm %s1253_s25, 1024  ;;  %s949_s4 = scalar_lea.hbm %s1309_s3, 2048 }
 0x14d   : > { %p946_p12 = scmp.ne.s32.totalorder %s1253_s25, %s945_s0  ;;  %p950_p6 = scmp.lt.u32.totalorder %s1253_s25, %s1309_s3 }
 0x14e   : > { %p951_p10 = scmp.lt.u32.totalorder %s949_s4, %s945_s0  ;;  %p953_p7 = scmp.lt.u32.totalorder %s945_s0, %s1253_s25 }
 0x14f   : > { %p947_p4 = pnand %p946_p12, %p1160_p13 }
 0x150   : > { %p952_p2 = por %p951_p10, %p950_p6 }
 0x151   : > { %p948_p5 = pneg %p947_p4 }
 0x152   : > { %p954_p9 = por %p953_p7, %p952_p2 }
 0x154   : > { %p955_p11 = pnand %p954_p9, %p948_p5 }
 0x156   : > { %958 = shalt.err (!%p955_p11)
}
 0x157   : > { %s1027_s16 = smov 128   ;;  %s1028_s30 = smov 8  }
 0x158   : > { %791 = dma.vmem_to_hbm [thread:$0]  (%p1160_p13), %s1246_s11, 1024, %s1253_s25, %s567_s6, %s1027_s16, %s1027_s16, %s1028_s30  }
 0x159 PF: > { %s598_s7 = sand.u32 1, %s999_s22   ;;  %p1327_p1 = scmp.ne.s32.totalorder %s1317_s5, 0 }
 0x15a   : > { %p1328_p0 = scmp.ge.s32.totalorder %s1019_s27, 2  ;;  %s599_s12 = scalar_lea.sflag [#allocation6], %s598_s7 }
 0x15c   : > { %p802_p3 = pnand %p1328_p0, %p1327_p1 }
 0x15e   : > { %994 = dma.done.wait (!%p802_p3), %s599_s12, 1024  }
 0x15f   : > { %996 = vsyncadd (!%p802_p3), %s599_s12, 4294966272  ;;  %s24_s27 = sadd.s32 1, %s1019_s27   ;;  %s1329_s22 = smov %s1003_s23 }
 0x160   : > { %p21_p8 = scmp.ge.s32.totalorder %s24_s27, 4   ;;  %s1330_s23 = smov %s1007_s24 }
 0x161   : > { %s1331_s24 = smov %s1169_s13  ;;  %s1332_s25 = smov %s1015_s26 }
 0x162   : > { %s1333_s26 = smov %s1335_s10  ;;  %23 = sbr.rel (!%p21_p8) target bundleno = 19 (0x13), region = 84 }
 0x169   :  { %604 = vsyncpa [#allocation5], 1 }
 0x16a   :  { %606 = vsyncpa [#allocation5 + $0x1], 1 }
 0x16b   :  { %607 = vsyncpa [#allocation8], 1 }
 0x16c   :  { %608 = vsyncpa [#allocation6], 1 }
 0x16d   :  { %610 = vsyncpa [#allocation6 + $0x1], 1 }

</bundles_post_ra>
